<compile_context>
chip_gen: v5e
topology: v5e:2x2
jax: 0.10.0
libtpu: 0.0.40
codegen_flags: <defaults>
</compile_context>

<pallas_src>
import jax
import jax.numpy as jnp
from jax.experimental import pallas as pl
from jax.experimental.pallas import tpu as pltpu


def _voting_kernel(a_ref, text_ref, image_ref, out_ref):
    # a_ref: SMEM (1,) -> softmax weight for text; image weight is 1 - a0.
    a0 = a_ref[0]
    # Cast in-kernel: HBM traffic stays at the native input width.
    t = text_ref[...].astype(jnp.float32)
    im = image_ref[...].astype(jnp.float32)
    # a0*t + (1-a0)*im == a0*(t - im) + im   (single VPU mul + add)
    combined = a0 * (t - im) + im
    # jax.nn.sigmoid -> lax.logistic (single EUP transcendental; cheaper than
    # exp + exact divide, still well within 1e-6 of the reference).
    out_ref[...] = jax.nn.sigmoid(combined).astype(out_ref.dtype)


def _vmem_budget():
    """Generation-aware (budget for block sizing, scoped VMEM limit)."""
    try:
        cap = int(pltpu.get_tpu_info().vmem_capacity_bytes)
    except Exception:
        cap = 64 << 20                       # assume the smallest (v7x) if unknown
    budget = min(cap // 2, 64 << 20)         # 64 MiB on v5e/v6e (128 MiB phys), 32 MiB on v7x
    limit = min((cap * 3) // 4, 96 << 20)    # 96 MiB on v5e/v6e, 48 MiB on v7x
    return budget, limit


def _lane_dense_layout(B, C):
    """Pick a 2-D (rows, lanes) view of the B*C elementwise problem whose last
    dim is a multiple of 128 (lane-dense unmasked stores). Row-major reshape is
    free for this purely elementwise op.  Falls back to the natural shape."""
    if C >= 128 and C % 128 == 0:
        return B, C
    total = B * C
    if total % 128 == 0:
        for lanes in (2048, 1024, 512, 256, 128):
            if total % lanes == 0:
                return total // lanes, lanes
    # Last resort: natural shape (block last dim == full array dim is legal,
    # stores are just lane-masked).
    return B, C


def _pick_tiles(rows, lanes, bytes_in, bytes_out, vmem_budget):
    """Largest (tile_r, tile_c) whose double-buffered footprint fits the budget,
    while keeping >=2 grid steps for non-tiny problems (megacore + pipeline)."""
    # 2 inputs + 1 output, each double-buffered by the Pallas pipeline.
    per_elem = 2 * (2 * bytes_in + bytes_out)

    # If even an 8-row full-width slab exceeds the budget, split the class axis
    # too (keeps the kernel usable for very wide rows; v7x has half the VMEM).
    tile_c = lanes
    if lanes % 128 == 0 and 8 * lanes * per_elem > vmem_budget:
        tile_c = max(128, (vmem_budget // (8 * per_elem)) // 128 * 128)
        tile_c = min(tile_c, lanes)

    max_rows = max(1, vmem_budget // (per_elem * tile_c))
    total_bytes = rows * lanes * (2 * bytes_in + bytes_out)

    if max_rows >= rows and (total_bytes <= (1 << 20) or rows < 16):
        tile_r = rows                                   # tiny problem: one block
    else:
        tile_r = min(max_rows, rows)
        if tile_r >= rows:
            # Non-tiny input that would fit in one block: force >=2 (prefer 4)
            # blocks so both v7x TensorCores and DMA/compute overlap engage.
            n_blocks = 4 if rows >= 32 else 2
            tile_r = -(-rows // n_blocks)
        tile_r = max(8, (tile_r // 8) * 8)              # sublane (8) alignment
        tile_r = min(tile_r, rows)
    return tile_r, tile_c


def learnable_majority_voting(text_prob, image_prob, w_text, w_image):
    assert text_prob.shape == image_prob.shape
    assert text_prob.dtype == image_prob.dtype
    B, C = text_prob.shape
    in_dtype = text_prob.dtype
    out_dtype = in_dtype if jnp.issubdtype(in_dtype, jnp.floating) else jnp.float32

    # Hoisted 2-way softmax, folded to a single scalar sigmoid:
    #   softmax([w_t, w_i])[0] == 1 / (1 + exp(w_i - w_t)) == sigmoid(w_t - w_i)
    a0 = jax.nn.sigmoid(jnp.asarray(w_text, jnp.float32)
                        - jnp.asarray(w_image, jnp.float32)).reshape(1)

    rows, lanes = _lane_dense_layout(B, C)
    t2 = text_prob.reshape(rows, lanes)
    i2 = image_prob.reshape(rows, lanes)

    budget, limit = _vmem_budget()
    tile_r, tile_c = _pick_tiles(rows, lanes,
                                 jnp.dtype(in_dtype).itemsize,
                                 jnp.dtype(out_dtype).itemsize,
                                 budget)

    grid = (pl.cdiv(rows, tile_r), pl.cdiv(lanes, tile_c))
    tile_spec = pl.BlockSpec((tile_r, tile_c), lambda i, j: (i, j))

    out = pl.pallas_call(
        _voting_kernel,
        out_shape=jax.ShapeDtypeStruct((rows, lanes), out_dtype),
        grid=grid,
        in_specs=[
            pl.BlockSpec(memory_space=pltpu.MemorySpace.SMEM),  # scalar weight a0
            tile_spec,                                          # text_prob
            tile_spec,                                          # image_prob
        ],
        out_specs=tile_spec,
        compiler_params=pltpu.CompilerParams(
            dimension_semantics=("parallel", "parallel"),
            vmem_limit_bytes=limit,
        ),
    )(a0, t2, i2)
    return out.reshape(B, C)


def reference(text_prob, image_prob, w_text, w_image):
    weights = jax.nn.softmax(jnp.stack([jnp.asarray(w_text, jnp.float32),
                                        jnp.asarray(w_image, jnp.float32)]))
    combined = (weights[0] * text_prob.astype(jnp.float32)
                + weights[1] * image_prob.astype(jnp.float32))
    return jax.nn.sigmoid(combined)


if __name__ == "__main__":
    key = jax.random.PRNGKey(0)
    k1, k2, k3, k4 = jax.random.split(key, 4)

    # Deterministic parameter init mirroring np.random.uniform(0.4, 0.6)
    w_text = jax.random.uniform(k1, (), jnp.float32, 0.4, 0.6)
    w_image = jax.random.uniform(k2, (), jnp.float32, 0.4, 0.6)

    # Main check: batch=16, num_classes=256 probabilities in [0, 1]
    B, C = 16, 256
    text_prob = jax.random.uniform(k3, (B, C), jnp.float32)
    image_prob = jax.random.uniform(k4, (B, C), jnp.float32)

    out = learnable_majority_voting(text_prob, image_prob, w_text, w_image)
    out = jax.block_until_ready(out)
    ref = reference(text_prob, image_prob, w_text, w_image)
    assert out.shape == (B, C) and out.dtype == jnp.float32
    assert jnp.allclose(out, ref, atol=1e-6, rtol=1e-6)

    # Extra check: small non-128 num_classes -> lane-dense flattened layout.
    B2, C2 = 8, 48
    tp2 = jax.random.uniform(k3, (B2, C2), jnp.float32)
    ip2 = jax.random.uniform(k4, (B2, C2), jnp.float32)
    out2 = jax.block_until_ready(
        learnable_majority_voting(tp2, ip2, w_text, w_image))
    assert jnp.allclose(out2, reference(tp2, ip2, w_text, w_image),
                        atol=1e-6, rtol=1e-6)

    print("KERNEL_OK")
</pallas_src>

<mosaic_0001>
module attributes {stable_mosaic.version = 11 : i64} {
  func.func @_voting_kernel(%arg0: i32, %arg1: i32, %arg2: memref<1xf32, #tpu.memory_space<smem>>, %arg3: memref<16x256xf32, #tpu.memory_space<vmem>>, %arg4: memref<16x256xf32, #tpu.memory_space<vmem>>, %arg5: memref<16x256xf32, #tpu.memory_space<vmem>>) attributes {dimension_semantics = [#tpu.dimension_semantics<parallel>, #tpu.dimension_semantics<parallel>], iteration_bounds = array<i64: 1, 1>, scalar_prefetch = 0 : i64, scratch_operands = 0 : i64, tpu.core_type = #tpu.core_type<tc>, window_params = [{transform_indices = @transform_0, window_bounds = array<i64: 1>}, {transform_indices = @transform_1, window_bounds = array<i64: 16, 256>}, {transform_indices = @transform_2, window_bounds = array<i64: 16, 256>}, {transform_indices = @transform_3, window_bounds = array<i64: 16, 256>}]} {
    %c0 = arith.constant 0 : index
    %0 = memref.load %arg2[%c0] : memref<1xf32, #tpu.memory_space<smem>>
    %c0_0 = arith.constant 0 : index
    %c0_1 = arith.constant 0 : index
    %1 = vector.load %arg3[%c0_0, %c0_1] : memref<16x256xf32, #tpu.memory_space<vmem>>, vector<16x256xf32>
    %c0_2 = arith.constant 0 : index
    %c0_3 = arith.constant 0 : index
    %2 = vector.load %arg4[%c0_2, %c0_3] : memref<16x256xf32, #tpu.memory_space<vmem>>, vector<16x256xf32>
    %3 = arith.subf %1, %2 : vector<16x256xf32>
    %4 = vector.broadcast %0 : f32 to vector<16x256xf32>
    %5 = arith.mulf %4, %3 : vector<16x256xf32>
    %6 = arith.addf %5, %2 : vector<16x256xf32>
    %7 = arith.negf %6 : vector<16x256xf32>
    %8 = math.exp %7 : vector<16x256xf32>
    %cst = arith.constant 1.000000e+00 : f32
    %9 = vector.broadcast %cst : f32 to vector<16x256xf32>
    %10 = arith.addf %9, %8 : vector<16x256xf32>
    %11 = arith.divf %9, %10 : vector<16x256xf32>
    %c0_4 = arith.constant 0 : index
    %c0_5 = arith.constant 0 : index
    %12 = vector.load %arg5[%c0_4, %c0_5] : memref<16x256xf32, #tpu.memory_space<vmem>>, vector<16x256xf32>
    tpu.vector_store %arg5[%c0_4, %c0_5], %11 {strides = array<i32>} : memref<16x256xf32, #tpu.memory_space<vmem>>, vector<16x256xf32>,
    return
  }
  func.func @transform_0(%arg0: i32, %arg1: i32) -> i32 {
    %c0_i32 = arith.constant 0 : i32
    %c0_i32_0 = arith.constant 0 : i32
    return %c0_i32 : i32
  }
  func.func @transform_1(%arg0: i32, %arg1: i32) -> (i32, i32) {
    %c0_i32 = arith.constant 0 : i32
    return %arg0, %arg1 : i32, i32
  }
  func.func @transform_2(%arg0: i32, %arg1: i32) -> (i32, i32) {
    %c0_i32 = arith.constant 0 : i32
    return %arg0, %arg1 : i32, i32
  }
  func.func @transform_3(%arg0: i32, %arg1: i32) -> (i32, i32) {
    %c0_i32 = arith.constant 0 : i32
    return %arg0, %arg1 : i32, i32
  }
}

</mosaic_0001>

<bundles_post_ra>
// kernel: tpu_custom_call.1
= control target key start
LH: loop header
LB: loop body
LE: loop exit
PB: predicated region body
PF: predicated region fallthrough
CT: control target
= control target key end

     0   :  { %9 = vsyncpa [#allocation4], 0  ;;  %s353_s0 = inlined_call_operand.<no memory space> [shape: f32[1], index: 0, kind: input, shape index: {}]   ;;  %s354_s1 = inlined_call_operand.hbm [shape: f32[16,256], index: 1, kind: input, shape index: {}]   ;;  %s355_s2 = inlined_call_operand.hbm [shape: f32[16,256], index: 2, kind: input, shape index: {}]   ;;  %s356_s3 = inlined_call_operand.hbm [shape: f32[16,256], index: 3, kind: output, shape index: {}]  }
   0x1   :  { %10 = vsyncpa [#allocation7], 0 }
   0x2   :  { %11 = vsyncpa [#allocation5], 0  ;;  %s18_s14 = sshll.u32 %s354_s1, 4  ;;  %s273_s15 = smov [#allocation3]   ;;  %s19_s14 = int_to_ptr.hbm [resolvable:$true] %s18_s14 }
   0x3   :  { %s20_s16 = sshll.u32 %s273_s15, 4  ;;  %s31_s19 = sshll.u32 %s355_s2, 4  ;;  %s21_s16 = int_to_ptr.vmem [resolvable:$true] %s20_s16  ;;  %s32_s19 = int_to_ptr.hbm [resolvable:$true] %s31_s19 }
   0x4   :  { %s274_s20 = smov 256   ;;  %s275_s21 = smov 16  }
   0x5   :  { %26 = dma.hbm_to_vmem [thread:$0]  %s19_s14, 512, %s21_s16, [#allocation4], %s274_s20, %s274_s20, %s275_s21  }
   0x6   :  { %s276_s22 = smov [#allocation6]  }
   0x7   :  { %s33_s23 = sshll.u32 %s276_s22, 4  ;;  %s34_s23 = int_to_ptr.vmem [resolvable:$true] %s33_s23 }
   0x8   :  { %39 = dma.hbm_to_vmem [thread:$0]  %s32_s19, 512, %s34_s23, [#allocation7], %s274_s20, %s274_s20, %s275_s21  }
   0x9   :  { %267 = dma.done.wait [#allocation4], 512  }
   0xa   :  { %268 = vsyncadd [#allocation4], 4294966784 }
   0xb   :  { %269 = dma.done.wait [#allocation7], 512  }
   0xc   :  { %270 = vsyncadd [#allocation7], 4294966784  ;;  %v49_v0 = vld [vmem:[#allocation3] sm:$0xff]  ;;  %v61_v2 = vstv %s353_s0  ;;  %v50_v3 = vld [vmem:[#allocation3 + $0x8] sm:$0xff]  ;;  %s277_s0 = smov [#allocation8]   ;;  %s156_s27 = sshll.u32 %s356_s3, 4  ;;  %s157_s27 = int_to_ptr.hbm [resolvable:$true] %s156_s27 }
   0xd   :  { %v53_v1 = vld [vmem:[#allocation6] sm:$0xff]  ;;  %v54_v5 = vld [vmem:[#allocation6 + $0x8] sm:$0xff]  ;;  %v51_v6 = vld [vmem:[#allocation3 + $0x10] sm:$0xff]  ;;  %s154_s24 = sshll.u32 %s277_s0, 4  ;;  %s155_s24 = int_to_ptr.vmem [resolvable:$true] %s154_s24 }
   0xe   :  { %v57_v4 = vsub.f32 %v49_v0, %v53_v1  ;;  %v55_v7 = vld [vmem:[#allocation6 + $0x10] sm:$0xff]  ;;  %v58_v8 = vsub.f32 %v50_v3, %v54_v5  ;;  %v52_v10 = vld [vmem:[#allocation3 + $0x18] sm:$0xff] }
   0xf   :  { %v59_v9 = vsub.f32 %v51_v6, %v55_v7  ;;  %v56_v11 = vld [vmem:[#allocation6 + $0x18] sm:$0xff] }
  0x10   :  { %v62_v12 = vmul.f32 %v61_v2, %v57_v4  ;;  %v60_v13 = vsub.f32 %v52_v10, %v56_v11  ;;  %v63_v14 = vmul.f32 %v61_v2, %v58_v8 }
  0x11   :  { %v64_v15 = vmul.f32 %v61_v2, %v59_v9 }
  0x12   :  { %v66_v16 = vadd.f32 %v62_v12, %v53_v1  ;;  %v65_v17 = vmul.f32 %v61_v2, %v60_v13  ;;  %v67_v18 = vadd.f32 %v63_v14, %v54_v5 }
  0x13   :  { %v68_v19 = vadd.f32 %v64_v15, %v55_v7 }
  0x14   :  { %v170_v20 = vmul.f32 -1.442695, %v66_v16  ;;  %v69_v21 = vadd.f32 %v65_v17, %v56_v11  ;;  %v171_v22 = vmul.f32 -1.442695, %v67_v18 }
  0x15   :  { %v172_v23 = vmul.f32 -1.442695, %v68_v19 }
  0x16   :  { %179 = vpow2.f32 %v170_v20  ;;  %v173_v24 = vmul.f32 -1.442695, %v69_v21 }
  0x17   :  { %181 = vpow2.f32 %v171_v22 }
  0x18   :  { %183 = vpow2.f32 %v172_v23 }
  0x19   :  { %185 = vpow2.f32 %v173_v24 }
  0x1c   :  { %v180_v25 = vpop.eup %179 }
  0x1d   :  { %v182_v26 = vpop.eup %181  ;;  %v82_v27 = vadd.f32 1.0, %v180_v25 }
  0x1e   :  { %v184_v28 = vpop.eup %183  ;;  %v83_v29 = vadd.f32 1.0, %v182_v26 }
  0x1f   :  { %v186_v30 = vpop.eup %185  ;;  %187 = vrcp.f32 %v82_v27  ;;  %v84_v31 = vadd.f32 1.0, %v184_v28  ;;  %v95_v33 = vand.u32 2147483647, %v82_v27  ;;  %v97_v34 = vand.u32 2147483648, %v82_v27 }
  0x20   :  { %189 = vrcp.f32 %v83_v29  ;;  %v85_v32 = vadd.f32 1.0, %v186_v30  ;;  %v110_v36 = vand.u32 2147483647, %v83_v29  ;;  %v112_v37 = vand.u32 2147483648, %v83_v29 }
  0x21   :  { %191 = vrcp.f32 %v84_v31  ;;  %vm91_vm0 = vweird.f32 %v82_v27  ;;  %vm106_vm1 = vweird.f32 %v83_v29  ;;  %vm313_vm3 = vcmp.eq.f32.partialorder %v95_v33, 8.507059e+37 }
  0x22   :  { %193 = vrcp.f32 %v85_v32  ;;  %v98_v43 = vor.u32 1.1754944e-38, %v97_v34  ;;  %vm317_vm5 = vcmp.eq.f32.partialorder %v110_v36, 8.507059e+37  ;;  %v113_v47 = vor.u32 1.1754944e-38, %v112_v37 }
  0x23   :  { %vm121_vm6 = vweird.f32 %v84_v31  ;;  %v125_v51 = vand.u32 2147483647, %v84_v31  ;;  %v127_v54 = vand.u32 2147483648, %v84_v31  ;;  %vm136_vm8 = vweird.f32 %v85_v32 }
  0x24   :  { %v142_v59 = vand.u32 2147483648, %v85_v32  ;;  %v140_v62 = vand.u32 2147483647, %v85_v32 }
  0x25   :  { %v188_v35 = vpop.eup %187  ;;  %v128_v4 = vor.u32 1.1754944e-38, %v127_v54  ;;  %vm126_vm13 = vcmp.eq.f32.partialorder %v125_v51, 8.507059e+37 }
  0x26   :  { %v190_v38 = vpop.eup %189  ;;  %v87_v39 = vmul.f32 %v188_v35, %v82_v27  ;;  %vm92_vm2 = vweird.f32 %v188_v35  ;;  %v143_v8 = vor.u32 1.1754944e-38, %v142_v59  ;;  %vm141_vm15 = vcmp.eq.f32.partialorder %v140_v62, 8.507059e+37 }
  0x27   :  { %v102_v40 = vmul.f32 %v190_v38, %v83_v29  ;;  %v192_v44 = vpop.eup %191  ;;  %vm107_vm4 = vweird.f32 %v190_v38  ;;  %vm322_vm7 = vmor %vm91_vm0, %vm92_vm2 }
  0x28   :  { %v88_v41 = vsub.f32 1.0, %v87_v39  ;;  %v194_v48 = vpop.eup %193  ;;  %v117_v50 = vmul.f32 %v192_v44, %v84_v31  ;;  %vm327_vm9 = vmor %vm106_vm1, %vm107_vm4  ;;  %vm122_vm10 = vweird.f32 %v192_v44 }
  0x29   :  { %v103_v45 = vsub.f32 1.0, %v102_v40  ;;  %v132_v55 = vmul.f32 %v194_v48, %v85_v32  ;;  %vm137_vm11 = vweird.f32 %v194_v48  ;;  %vm338_vm12 = vmor %vm121_vm6, %vm122_vm10 }
  0x2a   :  { %v89_v49 = vmul.f32 %v188_v35, %v88_v41  ;;  %v118_v58 = vsub.f32 1.0, %v117_v50  ;;  %vm138_vm14 = vmor %vm136_vm8, %vm137_vm11 }
  0x2b   :  { %v104_v53 = vmul.f32 %v190_v38, %v103_v45  ;;  %v133_v61 = vsub.f32 1.0, %v132_v55 }
  0x2c   :  { %v90_v56 = vadd.f32 %v188_v35, %v89_v49  ;;  %v119_v0 = vmul.f32 %v192_v44, %v118_v58 }
  0x2d   :  { %v105_v60 = vadd.f32 %v190_v38, %v104_v53  ;;  %v134_v5 = vmul.f32 %v194_v48, %v133_v61 }
  0x2e   :  { %v94_v63 = vsel %vm322_vm7, %v188_v35, %v90_v56  ;;  %v120_v7 = vadd.f32 %v192_v44, %v119_v0 }
  0x2f   :  { %v99_v1 = vsel %vm313_vm3, %v98_v43, %v94_v63  ;;  %v109_v2 = vsel %vm327_vm9, %v190_v38, %v105_v60  ;;  %v135_v9 = vadd.f32 %v194_v48, %v134_v5 }
  0x30   :  { %146 = vst [vmem:[#allocation8] sm:$0xff] %v99_v1  ;;  %v114_v6 = vsel %vm317_vm5, %v113_v47, %v109_v2  ;;  %v124_v10 = vsel %vm338_vm12, %v192_v44, %v120_v7 }
  0x31   :  { %147 = vst [vmem:[#allocation8 + $0x8] sm:$0xff] %v114_v6  ;;  %v129_v11 = vsel %vm126_vm13, %v128_v4, %v124_v10  ;;  %v139_v12 = vsel %vm138_vm14, %v194_v48, %v135_v9 }
  0x32   :  { %148 = vst [vmem:[#allocation8 + $0x10] sm:$0xff] %v129_v11  ;;  %v144_v13 = vsel %vm141_vm15, %v143_v8, %v139_v12 }
  0x33   :  { %149 = vst [vmem:[#allocation8 + $0x18] sm:$0xff] %v144_v13 }
  0x34   :  { %162 = dma.vmem_to_hbm [thread:$0]  %s155_s24, 512, %s157_s27, [#allocation5], %s274_s20, %s274_s20, %s275_s21  }
  0x35   :  { %271 = dma.done.wait [#allocation5], 512  }
  0x36   :  { %272 = vsyncadd [#allocation5], 4294966784 }
  0x37   :  { %167 = vsyncpa [#allocation4], 1 }
  0x38   :  { %168 = vsyncpa [#allocation7], 1 }
  0x39   :  { %169 = vsyncpa [#allocation5], 1 }

</bundles_post_ra>
